<compile_context>
chip_gen: v5e
topology: v5e:2x2
jax: 0.10.0
libtpu: 0.0.40
codegen_flags: <defaults>
</compile_context>

<pallas_src>
import functools

import jax
import jax.numpy as jnp
from jax.experimental import pallas as pl
from jax.experimental.pallas import tpu as pltpu

T_MAX = 1.0


def _inv_dyn_kernel(t_ref, xT_ref, epsT_ref, w1t_ref, b1t_ref, u1t_ref,
                    w2t_ref, b2t_ref, ndxT_ref, scal_ref, *, t_max):
    # ---- time reversal: dynamics is evaluated at (t_max - t); t is in SMEM ----
    t_rev = t_max - t_ref[0, 0]                               # scalar path

    xT = xT_ref[...]                                          # (D, TB) batch on lanes
    epsT = epsT_ref[...]                                      # (D, TB) Hutchinson noise
    w1t = w1t_ref[...]                                        # (H, D)
    w2t = w2t_ref[...]                                        # (D, H)

    # fold bias + time conditioning once per grid step: (H, 1)
    c1 = b1t_ref[...] + t_rev * u1t_ref[...]

    # ---- MXU: tiny weight latched, batch tile on N (lane-dense results) ----
    zw = jnp.dot(w1t, xT, preferred_element_type=jnp.float32)    # (H, TB) = W1^T x^T
    a = jnp.dot(w1t, epsT, preferred_element_type=jnp.float32)   # (H, TB) = W1^T eps^T

    h = jnp.tanh(zw + c1)                                     # EUP, lane-dense
    dtanh = 1.0 - h * h

    dxT = jnp.dot(w2t, h, preferred_element_type=jnp.float32) + b2t_ref[...]   # (D, TB)
    jepsT = jnp.dot(w2t, dtanh * a, preferred_element_type=jnp.float32)        # (D, TB)

    # ---- RegularizedInversedDynamics outputs ----
    ndxT_ref[...] = -dxT                                      # lane-dense unmasked store

    # feature reductions land directly as (1, TB) lane rows of the (3, B) slab
    scal_ref[0:1, :] = -jnp.sum(epsT * jepsT, axis=0, keepdims=True)   # -trace
    scal_ref[1:2, :] = jnp.sum(dxT * dxT, axis=0, keepdims=True)       # kinetic reg
    scal_ref[2:3, :] = jnp.sum(jepsT * jepsT, axis=0, keepdims=True)   # Frobenius reg


def _batch_tile(B, max_tb):
    """Pick a big lane-dense batch tile; prefer 2 even grid steps (v7x megacore)."""
    if B % 256 == 0 and B // 2 <= max_tb:
        return B // 2                         # 2 even, 128-aligned grid steps
    if B <= max_tb or B % 128 != 0:
        return B                              # single full-batch tile (always legal)
    tb = (max_tb // 128) * 128                # largest 128-multiple divisor <= max_tb
    while B % tb:
        tb -= 128
    return tb


def regularized_inversed_dynamics(t, state, eps, params, *, t_max=T_MAX,
                                  max_block_b=8192):
    """Mirrors RegularizedInversedDynamics.forward(t, state).

    state = [x, dlogp, reg_kinetic, reg_frobenius]; only x feeds the dynamics,
    the accumulator slots just fix the output structure (same as the torch code,
    where the dynamics returns one derivative per state tensor).
    Returns [-dx, -trace, t3, t4].
    """
    x, _dlogp, _r1, _r2 = state
    w1, b1, u1, w2, b2 = params
    B, D = x.shape
    H = w1.shape[1]

    tb = _batch_tile(B, max_block_b)
    grid = (B // tb,)

    t_arr = jnp.asarray(t, jnp.float32).reshape(1, 1)

    # batch-on-lane layout (layout plumbing outside the kernel, tiny tensors)
    xT = x.T                                   # (D, B)
    epsT = eps.T                               # (D, B)
    w1t = w1.T                                 # (H, D)
    w2t = w2.T                                 # (D, H)
    b1t = jnp.reshape(b1, (1, H)).T            # (H, 1)
    u1t = jnp.reshape(u1, (1, H)).T            # (H, 1)
    b2t = jnp.reshape(b2, (1, D)).T            # (D, 1)

    smem = pl.BlockSpec(memory_space=pltpu.MemorySpace.SMEM)
    in_specs = [
        smem,                                            # t (scalar, SMEM)
        pl.BlockSpec((D, tb), lambda i: (0, i)),         # x^T tile
        pl.BlockSpec((D, tb), lambda i: (0, i)),         # eps^T tile
        pl.BlockSpec((H, D), lambda i: (0, 0)),          # W1^T (VMEM-resident)
        pl.BlockSpec((H, 1), lambda i: (0, 0)),          # b1^T
        pl.BlockSpec((H, 1), lambda i: (0, 0)),          # u1^T (time conditioning)
        pl.BlockSpec((D, H), lambda i: (0, 0)),          # W2^T (VMEM-resident)
        pl.BlockSpec((D, 1), lambda i: (0, 0)),          # b2^T
    ]
    out_specs = (
        pl.BlockSpec((D, tb), lambda i: (0, i)),         # -dx^T, lane-dense
        pl.BlockSpec((3, tb), lambda i: (0, i)),         # [-trace; t3; t4] lane-dense
    )
    out_shape = (
        jax.ShapeDtypeStruct((D, B), jnp.float32),
        jax.ShapeDtypeStruct((3, B), jnp.float32),
    )

    # advisory cost: 4 matmuls of B*D*H MACs each, B*H tanh
    cost = pl.CostEstimate(
        flops=int(8 * B * D * H),
        transcendentals=int(B * H),
        bytes_accessed=int(4 * (3 * B * D + 3 * B + 2 * D * H + 2 * H + 2 * D + 1)),
    )

    kernel = functools.partial(_inv_dyn_kernel, t_max=float(t_max))

    neg_dxT, scal = pl.pallas_call(
        kernel,
        out_shape=out_shape,
        grid=grid,
        in_specs=in_specs,
        out_specs=out_specs,
        compiler_params=pltpu.CompilerParams(
            dimension_semantics=("parallel",),           # shard batch across TCs (v7x)
            vmem_limit_bytes=32 * 1024 * 1024,           # plenty even at tb=8192
        ),
        cost_estimate=cost,
    )(t_arr, xT, epsT, w1t, b1t, u1t, w2t, b2t)

    neg_dx = neg_dxT.T                                   # back to (B, D)
    neg_trace = scal[0].reshape(B, 1)
    t3 = scal[1].reshape(B, 1)
    t4 = scal[2].reshape(B, 1)
    # [-dx for dx in dxs] + [-trace] + [t3] + [t4]
    return [neg_dx, neg_trace, t3, t4]


def _reference(t, state, eps, params, t_max=T_MAX):
    x, *_ = state
    w1, b1, u1, w2, b2 = params
    t_rev = t_max - t
    z = x @ w1 + b1 + t_rev * u1
    h = jnp.tanh(z)
    dx = h @ w2 + b2
    a = eps @ w1
    jeps = ((1.0 - h * h) * a) @ w2
    trace = jnp.sum(eps * jeps, axis=-1, keepdims=True)
    t3 = jnp.sum(dx * dx, axis=-1, keepdims=True)
    t4 = jnp.sum(jeps * jeps, axis=-1, keepdims=True)
    return [-dx, -trace, t3, t4]


if __name__ == "__main__":
    # small shapes; B chosen so the default tiling gives 2 even grid steps
    B, D, H = 256, 16, 32
    key = jax.random.PRNGKey(0)
    kx, ke, k1, k2, k3, k4, k5 = jax.random.split(key, 7)

    # deterministic synthetic parameters for the wrapped dynamics
    # TODO(synk): the torch module takes an arbitrary `dynamics` callable; a
    # concrete RNODE-style MLP dynamics is instantiated here instead.
    w1 = jax.random.normal(k1, (D, H), jnp.float32) * (1.0 / jnp.sqrt(D))
    b1 = jax.random.normal(k2, (1, H), jnp.float32) * 0.1
    u1 = jax.random.normal(k3, (1, H), jnp.float32) * 0.1   # time conditioning
    w2 = jax.random.normal(k4, (H, D), jnp.float32) * (1.0 / jnp.sqrt(H))
    b2 = jax.random.normal(k5, (1, D), jnp.float32) * 0.1
    params = (w1, b1, u1, w2, b2)

    x = jax.random.normal(kx, (B, D), jnp.float32)
    eps = jnp.sign(jax.random.normal(ke, (B, D), jnp.float32))  # Rademacher noise
    state = [x, jnp.zeros((B, 1), jnp.float32),
             jnp.zeros((B, 1), jnp.float32), jnp.zeros((B, 1), jnp.float32)]

    t = 0.25
    outs = regularized_inversed_dynamics(t, state, eps, params)
    outs = jax.block_until_ready(outs)

    refs = _reference(jnp.float32(t), state, eps, params)
    for o, r in zip(outs, refs):
        assert o.shape == r.shape and o.dtype == r.dtype
        assert jnp.allclose(o, r, atol=3e-5, rtol=3e-5)

    print("KERNEL_OK")
</pallas_src>

<mosaic_0001>
module attributes {stable_mosaic.version = 11 : i64} {
  func.func @_inv_dyn_kernel(%arg0: i32, %arg1: memref<1x1xf32, #tpu.memory_space<smem>>, %arg2: memref<16x128xf32, #tpu.memory_space<vmem>>, %arg3: memref<16x128xf32, #tpu.memory_space<vmem>>, %arg4: memref<32x16xf32, #tpu.memory_space<vmem>>, %arg5: memref<32x1xf32, #tpu.memory_space<vmem>>, %arg6: memref<32x1xf32, #tpu.memory_space<vmem>>, %arg7: memref<16x32xf32, #tpu.memory_space<vmem>>, %arg8: memref<16x1xf32, #tpu.memory_space<vmem>>, %arg9: memref<16x128xf32, #tpu.memory_space<vmem>>, %arg10: memref<3x128xf32, #tpu.memory_space<vmem>>) attributes {dimension_semantics = [#tpu.dimension_semantics<parallel>], iteration_bounds = array<i64: 2>, scalar_prefetch = 0 : i64, scratch_operands = 0 : i64, tpu.core_type = #tpu.core_type<tc>, window_params = [{transform_indices = @transform_0, window_bounds = array<i64: 1, 1>}, {transform_indices = @transform_1, window_bounds = array<i64: 16, 128>}, {transform_indices = @transform_2, window_bounds = array<i64: 16, 128>}, {pipeline_mode = #tpu.pipeline_mode<synchronous>, transform_indices = @transform_3, window_bounds = array<i64: 32, 16>}, {pipeline_mode = #tpu.pipeline_mode<synchronous>, transform_indices = @transform_4, window_bounds = array<i64: 32, 1>}, {pipeline_mode = #tpu.pipeline_mode<synchronous>, transform_indices = @transform_5, window_bounds = array<i64: 32, 1>}, {pipeline_mode = #tpu.pipeline_mode<synchronous>, transform_indices = @transform_6, window_bounds = array<i64: 16, 32>}, {pipeline_mode = #tpu.pipeline_mode<synchronous>, transform_indices = @transform_7, window_bounds = array<i64: 16, 1>}, {transform_indices = @transform_8, window_bounds = array<i64: 16, 128>}, {transform_indices = @transform_9, window_bounds = array<i64: 3, 128>}]} {
    %c0 = arith.constant 0 : index
    %c0_0 = arith.constant 0 : index
    %0 = memref.load %arg1[%c0, %c0_0] : memref<1x1xf32, #tpu.memory_space<smem>>
    %cst = arith.constant 1.000000e+00 : f32
    %1 = arith.subf %cst, %0 : f32
    %c0_1 = arith.constant 0 : index
    %c0_2 = arith.constant 0 : index
    %2 = vector.load %arg2[%c0_1, %c0_2] : memref<16x128xf32, #tpu.memory_space<vmem>>, vector<16x128xf32>
    %c0_3 = arith.constant 0 : index
    %c0_4 = arith.constant 0 : index
    %3 = vector.load %arg3[%c0_3, %c0_4] : memref<16x128xf32, #tpu.memory_space<vmem>>, vector<16x128xf32>
    %c0_5 = arith.constant 0 : index
    %c0_6 = arith.constant 0 : index
    %4 = vector.load %arg4[%c0_5, %c0_6] : memref<32x16xf32, #tpu.memory_space<vmem>>, vector<32x16xf32>
    %c0_7 = arith.constant 0 : index
    %c0_8 = arith.constant 0 : index
    %5 = vector.load %arg7[%c0_7, %c0_8] : memref<16x32xf32, #tpu.memory_space<vmem>>, vector<16x32xf32>
    %c0_9 = arith.constant 0 : index
    %c0_10 = arith.constant 0 : index
    %6 = vector.load %arg5[%c0_9, %c0_10] : memref<32x1xf32, #tpu.memory_space<vmem>>, vector<32x1xf32>
    %c0_11 = arith.constant 0 : index
    %c0_12 = arith.constant 0 : index
    %7 = vector.load %arg6[%c0_11, %c0_12] : memref<32x1xf32, #tpu.memory_space<vmem>>, vector<32x1xf32>
    %8 = vector.broadcast %1 : f32 to vector<32x1xf32>
    %9 = arith.mulf %8, %7 : vector<32x1xf32>
    %10 = arith.addf %6, %9 : vector<32x1xf32>
    %cst_13 = arith.constant dense<0.000000e+00> : vector<32x128xf32>
    %11 = tpu.matmul %4, %2, %cst_13 {dimension_numbers = #tpu.dot_dimension_numbers<[1], [0], [0], [1], [0, 0, 1, 1], [], []>} : vector<32x16xf32>, vector<16x128xf32>, vector<32x128xf32> -> vector<32x128xf32>
    %cst_14 = arith.constant dense<0.000000e+00> : vector<32x128xf32>
    %12 = tpu.matmul %4, %3, %cst_14 {dimension_numbers = #tpu.dot_dimension_numbers<[1], [0], [0], [1], [0, 0, 1, 1], [], []>} : vector<32x16xf32>, vector<16x128xf32>, vector<32x128xf32> -> vector<32x128xf32>
    %13 = vector.broadcast %10 : vector<32x1xf32> to vector<32x128xf32>
    %14 = arith.addf %11, %13 : vector<32x128xf32>
    %15 = math.tanh %14 : vector<32x128xf32>
    %16 = arith.mulf %15, %15 : vector<32x128xf32>
    %cst_15 = arith.constant 1.000000e+00 : f32
    %17 = vector.broadcast %cst_15 : f32 to vector<32x128xf32>
    %18 = arith.subf %17, %16 : vector<32x128xf32>
    %cst_16 = arith.constant dense<0.000000e+00> : vector<16x128xf32>
    %19 = tpu.matmul %5, %15, %cst_16 {dimension_numbers = #tpu.dot_dimension_numbers<[1], [0], [0], [1], [0, 0, 1, 1], [], []>} : vector<16x32xf32>, vector<32x128xf32>, vector<16x128xf32> -> vector<16x128xf32>
    %c0_17 = arith.constant 0 : index
    %c0_18 = arith.constant 0 : index
    %20 = vector.load %arg8[%c0_17, %c0_18] : memref<16x1xf32, #tpu.memory_space<vmem>>, vector<16x1xf32>
    %21 = vector.broadcast %20 : vector<16x1xf32> to vector<16x128xf32>
    %22 = arith.addf %19, %21 : vector<16x128xf32>
    %23 = arith.mulf %18, %12 : vector<32x128xf32>
    %cst_19 = arith.constant dense<0.000000e+00> : vector<16x128xf32>
    %24 = tpu.matmul %5, %23, %cst_19 {dimension_numbers = #tpu.dot_dimension_numbers<[1], [0], [0], [1], [0, 0, 1, 1], [], []>} : vector<16x32xf32>, vector<32x128xf32>, vector<16x128xf32> -> vector<16x128xf32>
    %cst_20 = arith.constant 0.000000e+00 : f32
    %25 = vector.broadcast %cst_20 : f32 to vector<16x128xf32>
    %26 = arith.subf %25, %22 : vector<16x128xf32>
    %c0_21 = arith.constant 0 : index
    %c0_22 = arith.constant 0 : index
    %27 = vector.load %arg9[%c0_21, %c0_22] : memref<16x128xf32, #tpu.memory_space<vmem>>, vector<16x128xf32>
    tpu.vector_store %arg9[%c0_21, %c0_22], %26 {strides = array<i32>} : memref<16x128xf32, #tpu.memory_space<vmem>>, vector<16x128xf32>,
    %28 = arith.mulf %3, %24 : vector<16x128xf32>
    %cst_23 = arith.constant dense<0.000000e+00> : vector<128xf32>
    %29 = vector.multi_reduction <add>, %28, %cst_23 [0] : vector<16x128xf32> to vector<128xf32>
    %30 = vector.shape_cast %29 : vector<128xf32> to vector<1x128xf32>
    %cst_24 = arith.constant 0.000000e+00 : f32
    %31 = vector.broadcast %cst_24 : f32 to vector<1x128xf32>
    %32 = arith.subf %31, %30 : vector<1x128xf32>
    %c0_25 = arith.constant 0 : index
    %c0_26 = arith.constant 0 : index
    %33 = vector.load %arg10[%c0_25, %c0_26] : memref<3x128xf32, #tpu.memory_space<vmem>>, vector<1x128xf32>
    tpu.vector_store %arg10[%c0_25, %c0_26], %32 {strides = array<i32>} : memref<3x128xf32, #tpu.memory_space<vmem>>, vector<1x128xf32>,
    %34 = arith.mulf %22, %22 : vector<16x128xf32>
    %cst_27 = arith.constant dense<0.000000e+00> : vector<128xf32>
    %35 = vector.multi_reduction <add>, %34, %cst_27 [0] : vector<16x128xf32> to vector<128xf32>
    %36 = vector.shape_cast %35 : vector<128xf32> to vector<1x128xf32>
    %c1 = arith.constant 1 : index
    %c0_28 = arith.constant 0 : index
    %37 = vector.load %arg10[%c1, %c0_28] : memref<3x128xf32, #tpu.memory_space<vmem>>, vector<1x128xf32>
    tpu.vector_store %arg10[%c1, %c0_28], %36 {strides = array<i32>} : memref<3x128xf32, #tpu.memory_space<vmem>>, vector<1x128xf32>,
    %38 = arith.mulf %24, %24 : vector<16x128xf32>
    %cst_29 = arith.constant dense<0.000000e+00> : vector<128xf32>
    %39 = vector.multi_reduction <add>, %38, %cst_29 [0] : vector<16x128xf32> to vector<128xf32>
    %40 = vector.shape_cast %39 : vector<128xf32> to vector<1x128xf32>
    %c2 = arith.constant 2 : index
    %c0_30 = arith.constant 0 : index
    %41 = vector.load %arg10[%c2, %c0_30] : memref<3x128xf32, #tpu.memory_space<vmem>>, vector<1x128xf32>
    tpu.vector_store %arg10[%c2, %c0_30], %40 {strides = array<i32>} : memref<3x128xf32, #tpu.memory_space<vmem>>, vector<1x128xf32>,
    return
  }
  func.func @transform_0(%arg0: i32) -> (i32, i32) {
    %c0_i32 = arith.constant 0 : i32
    %c0_i32_0 = arith.constant 0 : i32
    %c0_i32_1 = arith.constant 0 : i32
    return %c0_i32, %c0_i32_0 : i32, i32
  }
  func.func @transform_1(%arg0: i32) -> (i32, i32) {
    %c0_i32 = arith.constant 0 : i32
    %c0_i32_0 = arith.constant 0 : i32
    return %c0_i32, %arg0 : i32, i32
  }
  func.func @transform_2(%arg0: i32) -> (i32, i32) {
    %c0_i32 = arith.constant 0 : i32
    %c0_i32_0 = arith.constant 0 : i32
    return %c0_i32, %arg0 : i32, i32
  }
  func.func @transform_3(%arg0: i32) -> (i32, i32) {
    %c0_i32 = arith.constant 0 : i32
    %c0_i32_0 = arith.constant 0 : i32
    %c0_i32_1 = arith.constant 0 : i32
    return %c0_i32, %c0_i32_0 : i32, i32
  }
  func.func @transform_4(%arg0: i32) -> (i32, i32) {
    %c0_i32 = arith.constant 0 : i32
    %c0_i32_0 = arith.constant 0 : i32
    %c0_i32_1 = arith.constant 0 : i32
    return %c0_i32, %c0_i32_0 : i32, i32
  }
  func.func @transform_5(%arg0: i32) -> (i32, i32) {
    %c0_i32 = arith.constant 0 : i32
    %c0_i32_0 = arith.constant 0 : i32
    %c0_i32_1 = arith.constant 0 : i32
    return %c0_i32, %c0_i32_0 : i32, i32
  }
  func.func @transform_6(%arg0: i32) -> (i32, i32) {
    %c0_i32 = arith.constant 0 : i32
    %c0_i32_0 = arith.constant 0 : i32
    %c0_i32_1 = arith.constant 0 : i32
    return %c0_i32, %c0_i32_0 : i32, i32
  }
  func.func @transform_7(%arg0: i32) -> (i32, i32) {
    %c0_i32 = arith.constant 0 : i32
    %c0_i32_0 = arith.constant 0 : i32
    %c0_i32_1 = arith.constant 0 : i32
    return %c0_i32, %c0_i32_0 : i32, i32
  }
  func.func @transform_8(%arg0: i32) -> (i32, i32) {
    %c0_i32 = arith.constant 0 : i32
    %c0_i32_0 = arith.constant 0 : i32
    return %c0_i32, %arg0 : i32, i32
  }
  func.func @transform_9(%arg0: i32) -> (i32, i32) {
    %c0_i32 = arith.constant 0 : i32
    %c0_i32_0 = arith.constant 0 : i32
    return %c0_i32, %arg0 : i32, i32
  }
}

</mosaic_0001>

<bundles_post_ra>
// kernel: tpu_custom_call.1
= control target key start
LH: loop header
LB: loop body
LE: loop exit
PB: predicated region body
PF: predicated region fallthrough
CT: control target
= control target key end

     0   :  { %s1267_s0 = inlined_call_operand.<no memory space> [shape: f32[1,1], index: 0, kind: input, shape index: {}]   ;;  %s1268_s1 = inlined_call_operand.vmem [shape: f32[16,256], index: 1, kind: input, shape index: {}]   ;;  %s1269_s2 = inlined_call_operand.vmem [shape: f32[16,256], index: 2, kind: input, shape index: {}]   ;;  %s1270_s3 = inlined_call_operand.vmem [shape: f32[32,16], index: 3, kind: input, shape index: {}]   ;;  %s1271_s4 = inlined_call_operand.vmem [shape: f32[32,1], index: 4, kind: input, shape index: {}]   ;;  %s1272_s5 = inlined_call_operand.vmem [shape: f32[32,1], index: 5, kind: input, shape index: {}]   ;;  %s1273_s6 = inlined_call_operand.vmem [shape: f32[16,32], index: 6, kind: input, shape index: {}]   ;;  %s1274_s7 = inlined_call_operand.vmem [shape: f32[16,1], index: 7, kind: input, shape index: {}]   ;;  %s1275_s8 = inlined_call_operand.hbm [shape: f32[16,256], index: 8, kind: output, shape index: {0}]   ;;  %s1276_s9 = inlined_call_operand.hbm [shape: f32[3,256], index: 9, kind: output, shape index: {1}]  }
   0x1   :  { %1277 = sst [smem:[#allocation11_spill]] %s1268_s1 }
   0x2   :  { %15 = sst [smem:[#allocation2]] %s1267_s0 }
   0x3   :  { %16 = vsyncpa [#allocation6], 0 }
   0x4   :  { %18 = vsyncpa [#allocation6 + $0x1], 0 }
   0x5   :  { %19 = vsyncpa [#allocation8], 0 }
   0x6   :  { %21 = vsyncpa [#allocation8 + $0x1], 0  ;;  %s1072_s11 = smov 0   ;;  %s1074_s12 = smov 0  }
   0x7   :  { %s1076_s13 = smov 0   ;;  %s1078_s14 = smov 0  }
   0x8 LB: > { %s1093_s0 = sadd.s32 4294967295, %s1013_s14   ;;  %s830_s15 = sadd.s32 4294967294, %s1013_s14   ;;  %s1013_s14 = sphi %s1078_s14, %s1285_s14   ;;  %s1009_s13 = sphi %s1076_s13, %s1284_s13   ;;  %s1005_s12 = sphi %s1074_s12, %s1283_s12   ;;  %s1001_s11 = sphi %s1072_s11, %s1282_s11  }
   0x9   : > { %s1097_s16 = sadd.s32 1, %s1013_s14   ;;  %s55_s17 = sadd.s32 1, %s1009_s13 }
   0xa   : > { %s52_s18 = ssub.s32 %s1013_s14, %s1097_s16  ;;  %p62_p0 = scmp.ne.s32.totalorder %s1009_s13, %s1005_s12 }
   0xb   : > { %p53_p1 = scmp.eq.s32.totalorder %s52_s18, 0  ;;  %p63_p2 = scmp.eq.s32.totalorder %s1013_s14, 0 }
   0xc   : > { %p223_p3 = scmp.eq.s32.totalorder %s1093_s0, 1  ;;  %p228_p4 = scmp.ne.s32.totalorder %s1005_s12, %s1001_s11 }
   0xd   : > { %s1109_s19 = scalar_select %p53_p1, %s1009_s13, %s55_s17  }
   0xe   : > { %p1111_p5 = por %p63_p2, %p62_p0  ;;  %p1115_p6 = por %p223_p3, %p62_p0 }
   0xf   : > { %p229_p7 = scmp.eq.s32.totalorder %s830_s15, 1  ;;  %p832_p9 = scmp.ge.s32.totalorder %s1013_s14, 2 }
  0x11   : > { %p1119_p8 = por %p229_p7, %p228_p4  ;;  %289 = sbr.rel (%p832_p9) target bundleno = 40 (0x28), region = 40 }
  0x16   : > { %292 = sbr.rel (!%p1111_p5) target bundleno = 34 (0x22), region = 44  ;;  %s294_s23 = sand.u32 (%p1111_p5), 1, %s1009_s13  }
  0x17   : > { %s834_s24 = sshll.u32 (%p1111_p5), %s1013_s14, 3  ;;  %s833_s25 = sshll.u32 (%p1111_p5), %s294_s23, 4 }
  0x18   : > { %s1281_s1 = sld [smem:[#allocation11_spill]] (%p1111_p5)  ;;  %s296_s29 = scalar_lea.vmem (%p1111_p5), [#allocation3], %s833_s25 }
  0x1e   : > { %s298_s28 = scalar_lea.vmem %s1281_s1, %s834_s24 }
  0x1f   : > { %v329_v0 = vld [vmem:[%s298_s28] sm:$0xff]  ;;  %v331_v1 = vld [vmem:[%s298_s28 + $0x10] sm:$0xff] }
  0x20   : > { %330 = vst [vmem:[%s296_s29] sm:$0xff] %v329_v0 }
  0x21   : > { %332 = vst [vmem:[%s296_s29 + $0x8] sm:$0xff] %v331_v1 }
  0x22 PF: > { %338 = sbr.rel (!%p1111_p5) target bundleno = 40 (0x28), region = 82  ;;  %s340_s30 = sand.u32 (%p1111_p5), 1, %s1009_s13  }
  0x23   : > { %s836_s10 = sshll.u32 (%p1111_p5), %s1013_s14, 3  ;;  %s835_s15 = sshll.u32 (%p1111_p5), %s340_s30, 4 }
  0x24   : > { %s344_s23 = scalar_lea.vmem (%p1111_p5), %s1269_s2, %s836_s10  ;;  %s342_s24 = scalar_lea.vmem (%p1111_p5), [#allocation4], %s835_s15 }
  0x25   : > { %v375_v2 = vld [vmem:[%s344_s23] sm:$0xff] (%p1111_p5)  ;;  %v377_v3 = vld [vmem:[%s344_s23 + $0x10] sm:$0xff] (%p1111_p5) }
  0x26   : > { %376 = vst [vmem:[%s342_s24] sm:$0xff] (%p1111_p5), %v375_v2 }
  0x27   : > { %378 = vst [vmem:[%s342_s24 + $0x8] sm:$0xff] %v377_v3 }
  0x28 PF: > { %p837_p10 = scmp.ge.s32.totalorder %s1013_s14, 1  ;;  %p383_p11 = scmp.lt.s32.totalorder %s1013_s14, 3 }
  0x2a   : > { %p384_p12 = pnand %p837_p10, %p383_p11 }
  0x2b   : > { %s1143_s20 = sand.u32 (!%p384_p12), 1, %s1005_s12   ;;  %s441_s25 = sld [smem:[#allocation2]] (!%p384_p12) }
  0x2c   : > { %387 = sbr.rel (%p384_p12) target bundleno = 388 (0x184), region = 120  ;;  %s1146_s26 = sshll.u32 (!%p384_p12), %s1143_s20, 4 }
  0x2d   : > { %s392_s27 = scalar_lea.vmem (!%p384_p12), [#allocation3], %s1146_s26  ;;  %s399_s30 = scalar_lea.vmem (!%p384_p12), [#allocation4], %s1146_s26 }
  0x2e   : > { %s856_s29 = sshll.u32 (!%p384_p12), %s1093_s0, 3 }
  0x2f   : > { %s693_s17 = scalar_lea.hbm (!%p384_p12), %s1275_s8, %s856_s29  ;;  %s939_s29 = scalar_lea.hbm (!%p384_p12), %s1275_s8, 32 }
  0x30   : > { %s696_s23 = sshll.u32 (!%p384_p12), %s693_s17, 4  ;;  %s697_s23 = int_to_ptr.hbm [resolvable:$true] %s696_s23 }
  0x31   : > { %v1015_v4 = vmov 0   ;;  %v444_v5 = vld [vmem:[%s392_s27 + $0x8] sm:$0xff]  ;;  %v443_v6 = vld [vmem:[%s392_s27] sm:$0xff]  ;;  %vm470_vm0 = vcmask 130048   ;;  %s442_s10 = ssub.f32 1.0, %s441_s25  ;;  %vm585_vm1 = vcmask 261120  }
  0x32   : > { %909 = vset.pattern.permute.xlu1 %v1015_v4  ;;  %908 = vset.pattern.permute.xlu0 %v1015_v4  ;;  %v447_v7 = vld [vmem:[%s1270_s3] sm:$0xff]  ;;  %v1153_v8 = vld [vmem:[%s399_s30 + $0x8] sm:$0xff]  ;;  %v459_v18 = vld [vmem:[%s1272_s5 + $0x10] sm:$0xff]  ;;  %s933_s24 = sshra.s32 %s697_s23, 4  ;;  %s934_s24 = int_to_ptr.hbm [resolvable:$true] %s933_s24 }
  0x33   : > { %910 = vset.pattern.permute.xlu2 %v1015_v4  ;;  %546 = vmatpush.msra.mxu1 %v444_v5  ;;  %v1155_v9 = vld [vmem:[%s399_s30] sm:$0xff]  ;;  %v458_v10 = vld [vmem:[%s1272_s5 + $0x8] sm:$0xff]  ;;  %v460_v11 = vld [vmem:[%s1272_s5 + $0x18] sm:$0xff]  ;;  %v461_v13 = vstv %s442_s10  ;;  %s433_s10 = scalar_lea.vmem [#allocation5], %s1146_s26  ;;  %s678_s26 = scalar_lea.sflag [#allocation6], %s1143_s20 }
  0x34   : > { %497 = vmatpush.msra.mxu0 %v1153_v8  ;;  %v454_v12 = vld [vmem:[%s1271_s4 + $0x8] sm:$0xff]  ;;  %v456_v14 = vld [vmem:[%s1271_s4 + $0x18] sm:$0xff]  ;;  %v463_v15 = vmul.f32 %v461_v13, %v458_v10  ;;  %v465_v16 = vmul.f32 %v461_v13, %v460_v11  ;;  %v457_v17 = vld [vmem:[%s1272_s5] sm:$0xff]  ;;  %v464_v23 = vmul.f32 %v461_v13, %v459_v18  ;;  %s694_s18 = sshll.u32 %s433_s10, 4  ;;  %s935_s27 = scalar_lea.hbm %s934_s24, 16  ;;  %s1217_s18 = int_to_ptr.vmem [resolvable:$true] %s694_s18 }
  0x35   : > { %547 = vmatpush.msra.mxu1 %v443_v6  ;;  %v448_v21 = vld [vmem:[%s1270_s3 + $0x8] sm:$0xff]  ;;  %v462_v22 = vmul.f32 %v461_v13, %v457_v17  ;;  %v453_v24 = vld [vmem:[%s1271_s4] sm:$0xff]  ;;  %v455_v25 = vld [vmem:[%s1271_s4 + $0x10] sm:$0xff]  ;;  %p936_p13 = scmp.ne.s32.totalorder %s934_s24, %s935_s27  ;;  %p940_p2 = scmp.lt.s32.totalorder %s934_s24, %s1275_s8 }
  0x36   : > { %846 = vmatmul.msk.f32.vlgmr.msra.gmra.mxu1 %vm470_vm0, %v447_v7  ;;  %498 = vmatpush.msra.mxu0 %v1155_v9  ;;  %v467_v19 = vadd.f32 %v463_v15, %v454_v12  ;;  %v469_v20 = vadd.f32 %v465_v16, %v456_v14  ;;  %v468_v27 = vadd.f32 %v464_v23, %v455_v25  ;;  %v449_v28 = vld [vmem:[%s1270_s3 + $0x10] sm:$0xff]  ;;  %v450_v29 = vld [vmem:[%s1270_s3 + $0x18] sm:$0xff]  ;;  %v573_v42 = vld [vmem:[%s1274_s7] sm:$0xff]  ;;  %p941_p3 = scmp.lt.s32.totalorder %s939_s29, %s935_s27 }
  0x37   : > { %842 = vmatmul.msk.f32.vlgmr.msra.gmra.mxu0 %vm470_vm0, %v447_v7  ;;  %v466_v26 = vadd.f32 %v462_v22, %v453_v24  ;;  %577 = vperm.xlu2 %910, %v573_v42   ;;  %v574_v47 = vld [vmem:[%s1274_s7 + $0x8] sm:$0xff]  ;;  %v451_v60 = vld [vmem:[%s1273_s6] sm:$0xff]  ;;  %p937_p0 = pnand %p936_p13, %p1115_p6 }
  0x38   : > { %519 = vperm.xlu1 %909, %v467_v19   ;;  %529 = vperm.xlu0 %908, %v469_v20   ;;  %v452_v1 = vld [vmem:[%s1273_s6 + $0x8] sm:$0xff]  ;;  %p942_p4 = por %p941_p3, %p940_p2 }
  0x39   : > { %p938_p1 = pneg %p937_p0 }
  0x3b   : > { %p943_p5 = pnand %p942_p4, %p938_p1 }
  0x3e   : > { %847 = vmatmul.msk.f32.gmra.mxu1 %vm470_vm0, %v448_v21 }
  0x3f   : > { %843 = vmatmul.msk.f32.gmra.mxu0 %vm470_vm0, %v448_v21  ;;  %582 = vperm.xlu2 %910, %v574_v47  }
  0x40   : > { %514 = vperm.xlu1 %909, %v466_v26   ;;  %524 = vperm.xlu0 %908, %v468_v27  }
  0x46   : > { %848 = vmatmul.msk.f32.gmra.mxu1 %vm470_vm0, %v449_v28 }
  0x47   : > { %844 = vmatmul.msk.f32.gmra.mxu0 %vm470_vm0, %v449_v28 }
  0x4e   : > { %849 = vmatmul.msk.f32.gmra.mxu1 %vm470_vm0, %v450_v29 }
  0x4f   : > { %845 = vmatmul.msk.f32.gmra.mxu0 %vm470_vm0, %v450_v29 }
  0x91   : > { %v578_v2 = vpop.permute.xlu2 %577 }
  0x99   : > { %v583_v7 = vpop.permute.xlu2 %582 }
  0xaa   : > { %v530_v32 = vpop.permute.xlu0 %529  ;;  %v520_v34 = vpop.permute.xlu1 %519 }
  0xb2   : > { %v525_v36 = vpop.permute.xlu0 %524  ;;  %v515_v38 = vpop.permute.xlu1 %514 }
  0xb3   : > { %v549_v30 = vpop.f32.mrf.mxu1 }
  0xb4   : > { %v500_v31 = vpop.f32.mrf.mxu0  ;;  %v550_v41 = vadd.f32 %v549_v30, %v515_v38 }
  0xbb   : > { %v552_v33 = vpop.f32.mrf.mxu1 }
  0xbc   : > { %v503_v35 = vpop.f32.mrf.mxu0  ;;  %v553_v40 = vadd.f32 %v552_v33, %v520_v34 }
  0xc3   : > { %v555_v37 = vpop.f32.mrf.mxu1 }
  0xc4   : > { %v556_v39 = vadd.f32 %v555_v37, %v525_v36  ;;  %v506_v45 = vpop.f32.mrf.mxu0 }
  0xc6   : > { %911 = vtanh.f32 %v556_v39 }
  0xc7   : > { %913 = vtanh.f32 %v553_v40 }
  0xc8   : > { %915 = vtanh.f32 %v550_v41 }
  0xcb   : > { %v558_v43 = vpop.f32.mrf.mxu1 }
  0xcc   : > { %v559_v44 = vadd.f32 %v558_v43, %v530_v32  ;;  %v912_v46 = vpop.eup %911  ;;  %v509_v54 = vpop.f32.mrf.mxu0 }
  0xcd   : > { %v914_v48 = vpop.eup %913  ;;  %v567_v50 = vmul.f32 %v912_v46, %v912_v46 }
  0xce   : > { %917 = vtanh.f32 %v559_v44  ;;  %v916_v49 = vpop.eup %915  ;;  %v566_v52 = vmul.f32 %v914_v48, %v914_v48 }
  0xcf   : > { %v565_v55 = vmul.f32 %v916_v49, %v916_v49  ;;  %v571_v56 = vsub.f32 1.0, %v567_v50 }
  0xd0   : > { %v570_v58 = vsub.f32 1.0, %v566_v52 }
  0xd1   : > { %v569_v61 = vsub.f32 1.0, %v565_v55  ;;  %v617_v62 = vmul.f32 %v571_v56, %v506_v45 }
  0xd2   : > { %v616_v63 = vmul.f32 %v570_v58, %v503_v35 }
  0xd3   : > { %v615_v0 = vmul.f32 %v569_v61, %v500_v31 }
  0xd4   : > { %v918_v51 = vpop.eup %917 }
  0xd5   : > { %604 = vmatpush.msra.mxu2 %v918_v51  ;;  %v568_v53 = vmul.f32 %v918_v51, %v918_v51 }
  0xd7   : > { %605 = vmatpush.msra.mxu2 %v912_v46  ;;  %v572_v57 = vsub.f32 1.0, %v568_v53 }
  0xd9   : > { %606 = vmatpush.msra.mxu2 %v914_v48  ;;  %v618_v59 = vmul.f32 %v572_v57, %v509_v54 }
  0xdb   : > { %607 = vmatpush.msra.mxu2 %v916_v49  ;;  %631 = vmatpush.msra.mxu3 %v618_v59 }
  0xdc   : > { %850 = vmatmul.msk.f32.vlgmr.msra.gmra.mxu2 %vm585_vm1, %v451_v60 }
  0xdd   : > { %632 = vmatpush.msra.mxu3 %v617_v62 }
  0xdf   : > { %633 = vmatpush.msra.mxu3 %v616_v63 }
  0xe1   : > { %634 = vmatpush.msra.mxu3 %v615_v0 }
  0xe2   : > { %852 = vmatmul.msk.f32.vlgmr.msra.gmra.mxu3 %vm585_vm1, %v451_v60 }
  0xe4   : > { %851 = vmatmul.msk.f32.gmra.mxu2 %vm585_vm1, %v452_v1 }
  0xea   : > { %853 = vmatmul.msk.f32.gmra.mxu3 %vm585_vm1, %v452_v1 }
 0x15f   : > { %v609_v3 = vpop.f32.mrf.mxu2 }
 0x160   : > { %v610_v4 = vadd.f32 %v609_v3, %v578_v2 }
 0x162   : > { %v642_v5 = vsub.f32 0.0, %v610_v4  ;;  %v657_v12 = vmul.f32 %v610_v4, %v610_v4 }
 0x164   : > { %644 = vst [vmem:[%s433_s10] sm:$0xff] %v642_v5 }
 0x165   : > { %v636_v6 = vpop.f32.mrf.mxu3 }
 0x166   : > { %v646_v16 = vmul.f32 %v636_v6, %v1155_v9 }
 0x167   : > { %v612_v10 = vpop.f32.mrf.mxu2 }
 0x168   : > { %v613_v11 = vadd.f32 %v612_v10, %v583_v7 }
 0x16a   : > { %v643_v13 = vsub.f32 0.0, %v613_v11  ;;  %v658_v14 = vmul.f32 %v613_v11, %v613_v11 }
 0x16c   : > { %645 = vst [vmem:[%s433_s10 + $0x8] sm:$0xff] %v643_v13  ;;  %v659_v15 = vadd.f32 %v658_v14, %v657_v12 }
 0x16d   : > { %v639_v17 = vpop.f32.mrf.mxu3 }
 0x16e   : > { %946 = shalt.err (!%p943_p5)
}
 0x16f   : > { %s1016_s17 = smov 128   ;;  %s1017_s10 = smov 256   ;;  %v667_v9 = vmul.f32 %v636_v6, %v636_v6  ;;  %v660_v18 = vrot.slane %v659_v15, 4  ;;  %v647_v19 = vmul.f32 %v639_v17, %v1153_v8  ;;  %v668_v20 = vmul.f32 %v639_v17, %v639_v17 }
 0x170   : > { %s1018_s1 = smov 8   ;;  %s841_s24 = sshll.u32 %s1143_s20, 2 }
 0x171   : > { %860 = dma.vmem_to_hbm [thread:$0]  (%p1115_p6), %s1217_s18, 256, %s697_s23, %s678_s26, %s1016_s17, %s1017_s10, %s1018_s1   ;;  %v661_v21 = vadd.f32 %v660_v18, %v659_v15  ;;  %v648_v22 = vadd.f32 %v647_v19, %v646_v16  ;;  %v669_v23 = vadd.f32 %v668_v20, %v667_v9 }
 0x172   : > { %s857_s27 = sshll.u32 %s1093_s0, 2  ;;  %s440_s26 = scalar_lea.vmem [#allocation7], %s841_s24 }
 0x173   : > { %v662_v24 = vrot.slane %v661_v21, 2  ;;  %v649_v25 = vrot.slane %v648_v22, 4  ;;  %v670_v26 = vrot.slane %v669_v23, 4  ;;  %s709_s23 = scalar_lea.hbm %s1276_s9, %s857_s27  ;;  %s711_s25 = sshll.u32 %s440_s26, 4  ;;  %s712_s25 = int_to_ptr.vmem [resolvable:$true] %s711_s25 }
 0x174   : > { %s713_s28 = sshll.u32 %s709_s23, 4  ;;  %s683_s0 = scalar_lea.sflag [#allocation8], %s1143_s20  ;;  %s714_s28 = int_to_ptr.hbm [resolvable:$true] %s713_s28 }
 0x175   : > { %v663_v27 = vadd.f32 %v662_v24, %v661_v21  ;;  %v650_v28 = vadd.f32 %v649_v25, %v648_v22  ;;  %v671_v29 = vadd.f32 %v670_v26, %v669_v23  ;;  %s961_s29 = sshra.s32 %s714_s28, 4  ;;  %s967_s10 = scalar_lea.hbm %s1276_s9, 8  ;;  %s962_s29 = int_to_ptr.hbm [resolvable:$true] %s961_s29 }
 0x176   : > { %s963_s30 = scalar_lea.hbm %s962_s29, 4  ;;  %p968_p12 = scmp.lt.s32.totalorder %s962_s29, %s1276_s9 }
 0x177   : > { %v664_v30 = vrot.slane %v663_v27, 1  ;;  %v651_v31 = vrot.slane %v650_v28, 2  ;;  %v672_v32 = vrot.slane %v671_v29, 2  ;;  %p964_p7 = scmp.ne.s32.totalorder %s962_s29, %s963_s30  ;;  %p969_p13 = scmp.lt.s32.totalorder %s967_s10, %s963_s30 }
 0x179   : > { %v652_v33 = vadd.f32 %v651_v31, %v650_v28  ;;  %v673_v34 = vadd.f32 %v672_v32, %v671_v29  ;;  %v665_v35 = vadd.f32 %v664_v30, %v663_v27  ;;  %p965_p10 = pnand %p964_p7, %p1115_p6  ;;  %p970_p0 = por %p969_p13, %p968_p12 }
 0x17b   : > { %v653_v8 = vrot.slane %v652_v33, 1  ;;  %v674_v36 = vrot.slane %v673_v34, 1  ;;  %666 = vst [vmem:[%s440_s26 + $0x1] sm:$0x1] %v665_v35  ;;  %p966_p11 = pneg %p965_p10 }
 0x17d   : > { %v654_v37 = vadd.f32 %v653_v8, %v652_v33  ;;  %v675_v38 = vadd.f32 %v674_v36, %v673_v34  ;;  %p971_p1 = pnand %p970_p0, %p966_p11 }
 0x17f   : > { %v655_v39 = vsub.f32 0.0, %v654_v37  ;;  %676 = vst [vmem:[%s440_s26 + $0x2] sm:$0x1] %v675_v38 }
 0x181   : > { %656 = vst [vmem:[%s440_s26] sm:$0x1] %v655_v39 }
 0x182   : > { %974 = shalt.err (!%p971_p1)
}
 0x183   : > { %861 = dma.vmem_to_hbm [thread:$0]  (%p1115_p6), %s712_s25, 64, %s714_s28, %s683_s0  }
 0x184 PF: > { %s725_s20 = sand.u32 1, %s1001_s11   ;;  %p865_p2 = pnand %p832_p9, %p1119_p8 }
 0x185   : > { %s726_s1 = scalar_lea.sflag [#allocation6], %s725_s20 }
 0x186   : > { %p866_p3 = pneg %p865_p2 }
 0x188   : > { %992 = dma.done.wait (%p866_p3), %s726_s1, 256  }
 0x189   : > { %994 = vsyncadd (%p866_p3), %s726_s1, 4294967040  ;;  %s736_s18 = scalar_lea.sflag [#allocation8], %s725_s20 }
 0x18a   : > { %996 = dma.done.wait (%p866_p3), %s736_s18, 64  }
 0x18b   : > { %998 = vsyncadd (%p866_p3), %s736_s18, 4294967232  ;;  %p24_p6 = scmp.ge.s32.totalorder %s1097_s16, 4   ;;  %s1282_s11 = smov %s1005_s12 }
 0x18c   : > { %s1283_s12 = smov %s1009_s13  ;;  %s1284_s13 = smov %s1109_s19 }
 0x18d   : > { %s1285_s14 = smov %s1097_s16  ;;  %26 = sbr.rel (!%p24_p6) target bundleno = 8 (0x8), region = 193 }
 0x192   :  { %742 = vsyncpa [#allocation6], 1 }
 0x193   :  { %744 = vsyncpa [#allocation6 + $0x1], 1 }
 0x194   :  { %745 = vsyncpa [#allocation8], 1 }
 0x195   :  { %747 = vsyncpa [#allocation8 + $0x1], 1 }

</bundles_post_ra>
